<compile_context>
chip_gen: v7x
topology: tpu7x:2x2x1
jax: 0.10.0
libtpu: 0.0.40
codegen_flags: <defaults>
</compile_context>

<pallas_src>
import jax
import jax.numpy as jnp
from jax.experimental import pallas as pl
from jax.experimental.pallas import tpu as pltpu


def _round_up(x, m):
    return ((x + m - 1) // m) * m


def _make_kernel(N, F, TN, F_TILE, bpc, need_row_mask, need_lane_mask):
    def kernel(p_ref, r_ref, m_ref, w_ref, o1_ref, o2_ref, o3_ref):
        c = pl.program_id(0)   # core split (parallel)
        i = pl.program_id(1)   # row blocks within a core (reduction)
        j = pl.program_id(2)   # lane blocks (reduction)

        @pl.when((i == 0) & (j == 0))
        def _init():
            o1_ref[...] = jnp.zeros_like(o1_ref)
            o2_ref[...] = jnp.zeros_like(o2_ref)
            o3_ref[...] = jnp.zeros_like(o3_ref)

        # Mirror torch's .to(float); inputs stay narrow on the DMA path.
        m = m_ref[...].astype(jnp.float32)
        p = p_ref[...].astype(jnp.float32) - m
        r = r_ref[...].astype(jnp.float32) - m

        # Mask out-of-range rows/lanes (partial blocks read unspecified VMEM;
        # select-based masking is NaN/Inf safe).  Only emitted when needed.
        if need_row_mask or need_lane_mask:
            ok = None
            if need_row_mask:
                row_start = (c * bpc + i) * TN
                rows = jax.lax.broadcasted_iota(jnp.int32, (TN, 1), 0) + row_start
                ok = rows < N
            if need_lane_mask:
                lanes = (jax.lax.broadcasted_iota(jnp.int32, (1, F_TILE), 1)
                         + j * F_TILE)
                lane_ok = lanes < F
                ok = lane_ok if ok is None else jnp.logical_and(ok, lane_ok)
            p = jnp.where(ok, p, 0.0)
            r = jnp.where(ok, r, 0.0)

        w = w_ref[...]                    # (1, F_TILE) f32, zero in padded lanes
        pw = p * w
        # Fully reduce the slab each step; accumulate scalars in the resident
        # output blocks (constant block index over i and j).
        o1_ref[...] += jnp.sum(pw * r, axis=(0, 1), keepdims=True)
        o2_ref[...] += jnp.sum(pw * p, axis=(0, 1), keepdims=True)
        o3_ref[...] += jnp.sum(r * r * w, axis=(0, 1), keepdims=True)

    return kernel


def acc_loss(predict, real, mean, weight, *, block_bytes=4 << 20, num_cores=2):
    """predict/real/mean: (B, C, H, W); weight: (H, 1) or (H,). Returns scalar."""
    B, C, H, W = predict.shape
    assert real.shape == predict.shape
    # TODO(synk): if `mean` is a climatology broadcast over batch (e.g. (1,C,H,W)),
    # give it its own un-broadcast index_map instead of requiring the full shape.
    assert mean.shape == predict.shape
    N = B * C
    F = H * W

    # Free (no-copy) views: merge contiguous dims; no padding of the big arrays.
    p2 = predict.reshape(N, F)
    r2 = real.reshape(N, F)
    m2 = mean.reshape(N, F)

    itemsize = max(jnp.dtype(x.dtype).itemsize for x in (p2, r2, m2))
    target_elems = max(block_bytes // itemsize, 8 * 128)

    if F <= target_elems // 8:
        # Whole rows fit comfortably: last block dim equals the full (un-padded) F.
        F_TILE = F
        tn_target = max(8, (target_elems // F) // 8 * 8)
        # Keep >= num_cores row blocks when N allows, so the core split has work.
        tn_cap = max(8, _round_up(-(-N // num_cores), 8))
        TN = min(tn_target, tn_cap)
    else:
        # A single row is huge (e.g. 721*1440): tile the lane axis instead.
        TN = 8
        F_TILE = max(128, (target_elems // TN) // 128 * 128)
        F_TILE = min(F_TILE, _round_up(F, 128))

    f_blocks = pl.cdiv(F, F_TILE)
    row_blocks = pl.cdiv(N, TN)
    cores = min(num_cores, row_blocks)
    bpc = pl.cdiv(row_blocks, cores)          # row blocks per core

    F_pad = f_blocks * F_TILE
    need_lane_mask = (F_pad != F)
    need_row_mask = (cores * bpc * TN != N)
    clamp_rows = (cores * bpc != row_blocks)  # virtual blocks past the last real one

    # weight (H,1) -> (H,W) -> (1,F); tiny, zero-padded to the lane tiling so
    # padded lanes can never inject NaN/Inf into the (masked) products.
    w_row = jnp.broadcast_to(jnp.asarray(weight, jnp.float32).reshape(H, 1), (H, W))
    w_row = w_row.reshape(1, F)
    if F_pad != F:
        w_row = jnp.pad(w_row, ((0, 0), (0, F_pad - F)))

    def in_map(c, i, j):
        rb = c * bpc + i
        if clamp_rows:
            rb = jnp.minimum(rb, row_blocks - 1)   # re-read last block; masked to 0
        return (rb, j)

    out_spec = pl.BlockSpec((1, 1, 1), lambda c, i, j: (c, 0, 0))
    out_sds = jax.ShapeDtypeStruct((cores, 1, 1), jnp.float32)

    kernel = _make_kernel(N, F, TN, F_TILE, bpc, need_row_mask, need_lane_mask)

    # VMEM: 3 double-buffered input slabs (in their own dtype) + double-buffered
    # weight block + tiny outputs + headroom.
    in_bytes = sum(TN * F_TILE * jnp.dtype(x.dtype).itemsize for x in (p2, r2, m2))
    vmem_bytes = 2 * in_bytes + 2 * F_TILE * 4 + 6 * 1 * 4 + (2 << 20)
    vmem_limit = int(min(max(vmem_bytes, 16 << 20), 48 << 20))

    o1, o2, o3 = pl.pallas_call(
        kernel,
        out_shape=(out_sds, out_sds, out_sds),
        grid_spec=pltpu.PrefetchScalarGridSpec(
            num_scalar_prefetch=0,
            grid=(cores, bpc, f_blocks),
            in_specs=[
                pl.BlockSpec((TN, F_TILE), in_map),
                pl.BlockSpec((TN, F_TILE), in_map),
                pl.BlockSpec((TN, F_TILE), in_map),
                pl.BlockSpec((1, F_TILE), lambda c, i, j: (0, j)),
            ],
            out_specs=[out_spec, out_spec, out_spec],
        ),
        compiler_params=pltpu.CompilerParams(
            dimension_semantics=("parallel", "arbitrary", "arbitrary"),
            vmem_limit_bytes=vmem_limit,
        ),
    )(p2, r2, m2, w_row)

    # Combine per-core partial sums (trivial scalar work) in JAX.
    s1 = jnp.sum(o1[:, 0, 0])
    s2 = jnp.sum(o2[:, 0, 0])
    s3 = jnp.sum(o3[:, 0, 0])
    return s1 / jnp.sqrt(s2 * s3)


def acc_loss_ref(predict, real, mean, weight):
    p = predict.astype(jnp.float32) - mean.astype(jnp.float32)
    r = real.astype(jnp.float32) - mean.astype(jnp.float32)
    frac_1 = jnp.sum(p * r * weight)
    frac_2 = jnp.sqrt(jnp.sum(p ** 2 * weight) * jnp.sum(r ** 2 * weight))
    return frac_1 / frac_2


if __name__ == "__main__":
    B, C, H, W = 2, 4, 16, 16

    # TODO(synk): real module loads lat.pt from disk; we synthesize an evenly
    # spaced latitude grid instead.
    lat = jnp.linspace(-87.5, 87.5, H, dtype=jnp.float32)
    weight = jnp.cos(lat / 180.0 * jnp.pi)
    weight = weight / jnp.mean(weight)
    weight = weight[:, None]  # (H, 1), matches torch unsqueeze(1)

    key = jax.random.PRNGKey(0)
    k1, k2, k3 = jax.random.split(key, 3)
    predict = jax.random.normal(k1, (B, C, H, W), dtype=jnp.float32)
    real = 0.5 * predict + 0.5 * jax.random.normal(k2, (B, C, H, W), jnp.float32)
    mean = 0.1 * jax.random.normal(k3, (B, C, H, W), dtype=jnp.float32)

    loss = acc_loss(predict, real, mean, weight)
    loss = jax.block_until_ready(loss)

    ref = acc_loss_ref(predict, real, mean, weight)
    assert jnp.allclose(loss, ref, rtol=1e-4, atol=1e-5), (loss, ref)

    print("KERNEL_OK")
</pallas_src>

<mosaic_0001>
module attributes {stable_mosaic.version = 11 : i64} {
  func.func @kernel(%arg0: i32, %arg1: i32, %arg2: i32, %arg3: memref<8x256xf32, #tpu.memory_space<vmem>>, %arg4: memref<8x256xf32, #tpu.memory_space<vmem>>, %arg5: memref<8x256xf32, #tpu.memory_space<vmem>>, %arg6: memref<1x256xf32, #tpu.memory_space<vmem>>, %arg7: memref<1x1x1xf32, #tpu.memory_space<vmem>>, %arg8: memref<1x1x1xf32, #tpu.memory_space<vmem>>, %arg9: memref<1x1x1xf32, #tpu.memory_space<vmem>>) attributes {dimension_semantics = [#tpu.dimension_semantics<parallel>, #tpu.dimension_semantics<arbitrary>, #tpu.dimension_semantics<arbitrary>], iteration_bounds = array<i64: 1, 1, 1>, scalar_prefetch = 0 : i64, scratch_operands = 0 : i64, tpu.core_type = #tpu.core_type<tc>, window_params = [{transform_indices = @transform_0, window_bounds = array<i64: 8, 256>}, {transform_indices = @transform_1, window_bounds = array<i64: 8, 256>}, {transform_indices = @transform_2, window_bounds = array<i64: 8, 256>}, {transform_indices = @transform_3, window_bounds = array<i64: 1, 256>}, {transform_indices = @transform_4, window_bounds = array<i64: 1, 1, 1>}, {transform_indices = @transform_5, window_bounds = array<i64: 1, 1, 1>}, {transform_indices = @transform_6, window_bounds = array<i64: 1, 1, 1>}]} {
    %c0_i32 = arith.constant 0 : i32
    %0 = arith.cmpi eq, %arg1, %c0_i32 : i32
    %c0_i32_0 = arith.constant 0 : i32
    %1 = arith.cmpi eq, %arg2, %c0_i32_0 : i32
    %2 = arith.andi %0, %1 : i1
    %3 = arith.extui %2 : i1 to i32
    %c0_i32_1 = arith.constant 0 : i32
    %4 = arith.cmpi ne, %3, %c0_i32_1 : i32
    scf.if %4 {
      %cst_29 = arith.constant 0.000000e+00 : f32
      %45 = vector.broadcast %cst_29 : f32 to vector<1x1x1xf32>
      %c0_30 = arith.constant 0 : index
      %c0_31 = arith.constant 0 : index
      %c0_32 = arith.constant 0 : index
      %46 = vector.load %arg7[%c0_30, %c0_31, %c0_32] : memref<1x1x1xf32, #tpu.memory_space<vmem>>, vector<1x1x1xf32>
      tpu.vector_store %arg7[%c0_30, %c0_31, %c0_32], %45 {strides = array<i32>} : memref<1x1x1xf32, #tpu.memory_space<vmem>>, vector<1x1x1xf32>,
      %cst_33 = arith.constant 0.000000e+00 : f32
      %47 = vector.broadcast %cst_33 : f32 to vector<1x1x1xf32>
      %c0_34 = arith.constant 0 : index
      %c0_35 = arith.constant 0 : index
      %c0_36 = arith.constant 0 : index
      %48 = vector.load %arg8[%c0_34, %c0_35, %c0_36] : memref<1x1x1xf32, #tpu.memory_space<vmem>>, vector<1x1x1xf32>
      tpu.vector_store %arg8[%c0_34, %c0_35, %c0_36], %47 {strides = array<i32>} : memref<1x1x1xf32, #tpu.memory_space<vmem>>, vector<1x1x1xf32>,
      %cst_37 = arith.constant 0.000000e+00 : f32
      %49 = vector.broadcast %cst_37 : f32 to vector<1x1x1xf32>
      %c0_38 = arith.constant 0 : index
      %c0_39 = arith.constant 0 : index
      %c0_40 = arith.constant 0 : index
      %50 = vector.load %arg9[%c0_38, %c0_39, %c0_40] : memref<1x1x1xf32, #tpu.memory_space<vmem>>, vector<1x1x1xf32>
      tpu.vector_store %arg9[%c0_38, %c0_39, %c0_40], %49 {strides = array<i32>} : memref<1x1x1xf32, #tpu.memory_space<vmem>>, vector<1x1x1xf32>,
    } else {
    }
    %c0 = arith.constant 0 : index
    %c0_2 = arith.constant 0 : index
    %5 = vector.load %arg5[%c0, %c0_2] : memref<8x256xf32, #tpu.memory_space<vmem>>, vector<8x256xf32>
    %c0_3 = arith.constant 0 : index
    %c0_4 = arith.constant 0 : index
    %6 = vector.load %arg3[%c0_3, %c0_4] : memref<8x256xf32, #tpu.memory_space<vmem>>, vector<8x256xf32>
    %7 = arith.subf %6, %5 : vector<8x256xf32>
    %c0_5 = arith.constant 0 : index
    %c0_6 = arith.constant 0 : index
    %8 = vector.load %arg4[%c0_5, %c0_6] : memref<8x256xf32, #tpu.memory_space<vmem>>, vector<8x256xf32>
    %9 = arith.subf %8, %5 : vector<8x256xf32>
    %c0_7 = arith.constant 0 : index
    %c0_8 = arith.constant 0 : index
    %10 = vector.load %arg6[%c0_7, %c0_8] : memref<1x256xf32, #tpu.memory_space<vmem>>, vector<1x256xf32>
    %11 = vector.broadcast %10 : vector<1x256xf32> to vector<8x256xf32>
    %12 = arith.mulf %7, %11 : vector<8x256xf32>
    %c0_9 = arith.constant 0 : index
    %c0_10 = arith.constant 0 : index
    %c0_11 = arith.constant 0 : index
    %13 = vector.load %arg7[%c0_9, %c0_10, %c0_11] : memref<1x1x1xf32, #tpu.memory_space<vmem>>, vector<1x1x1xf32>
    %14 = arith.mulf %12, %9 : vector<8x256xf32>
    %15 = vector.shape_cast %14 : vector<8x256xf32> to vector<1x8x256xf32>
    %cst = arith.constant dense<0.000000e+00> : vector<1xf32>
    %16 = vector.multi_reduction <add>, %15, %cst [1, 2] : vector<1x8x256xf32> to vector<1xf32>
    %17 = vector.shape_cast %16 : vector<1xf32> to vector<1x1x1xf32>
    %18 = vector.extract %17[0, 0, 0] : f32 from vector<1x1x1xf32>
    %19 = vector.broadcast %18 : f32 to vector<1x1xf32>
    %20 = vector.shape_cast %19 : vector<1x1xf32> to vector<1x1x1xf32>
    %21 = arith.addf %13, %20 : vector<1x1x1xf32>
    %c0_12 = arith.constant 0 : index
    %c0_13 = arith.constant 0 : index
    %c0_14 = arith.constant 0 : index
    %22 = vector.load %arg7[%c0_12, %c0_13, %c0_14] : memref<1x1x1xf32, #tpu.memory_space<vmem>>, vector<1x1x1xf32>
    tpu.vector_store %arg7[%c0_12, %c0_13, %c0_14], %21 {strides = array<i32>} : memref<1x1x1xf32, #tpu.memory_space<vmem>>, vector<1x1x1xf32>,
    %c0_15 = arith.constant 0 : index
    %c0_16 = arith.constant 0 : index
    %c0_17 = arith.constant 0 : index
    %23 = vector.load %arg8[%c0_15, %c0_16, %c0_17] : memref<1x1x1xf32, #tpu.memory_space<vmem>>, vector<1x1x1xf32>
    %24 = arith.mulf %12, %7 : vector<8x256xf32>
    %25 = vector.shape_cast %24 : vector<8x256xf32> to vector<1x8x256xf32>
    %cst_18 = arith.constant dense<0.000000e+00> : vector<1xf32>
    %26 = vector.multi_reduction <add>, %25, %cst_18 [1, 2] : vector<1x8x256xf32> to vector<1xf32>
    %27 = vector.shape_cast %26 : vector<1xf32> to vector<1x1x1xf32>
    %28 = vector.extract %27[0, 0, 0] : f32 from vector<1x1x1xf32>
    %29 = vector.broadcast %28 : f32 to vector<1x1xf32>
    %30 = vector.shape_cast %29 : vector<1x1xf32> to vector<1x1x1xf32>
    %31 = arith.addf %23, %30 : vector<1x1x1xf32>
    %c0_19 = arith.constant 0 : index
    %c0_20 = arith.constant 0 : index
    %c0_21 = arith.constant 0 : index
    %32 = vector.load %arg8[%c0_19, %c0_20, %c0_21] : memref<1x1x1xf32, #tpu.memory_space<vmem>>, vector<1x1x1xf32>
    tpu.vector_store %arg8[%c0_19, %c0_20, %c0_21], %31 {strides = array<i32>} : memref<1x1x1xf32, #tpu.memory_space<vmem>>, vector<1x1x1xf32>,
    %c0_22 = arith.constant 0 : index
    %c0_23 = arith.constant 0 : index
    %c0_24 = arith.constant 0 : index
    %33 = vector.load %arg9[%c0_22, %c0_23, %c0_24] : memref<1x1x1xf32, #tpu.memory_space<vmem>>, vector<1x1x1xf32>
    %34 = arith.mulf %9, %9 : vector<8x256xf32>
    %35 = vector.broadcast %10 : vector<1x256xf32> to vector<8x256xf32>
    %36 = arith.mulf %34, %35 : vector<8x256xf32>
    %37 = vector.shape_cast %36 : vector<8x256xf32> to vector<1x8x256xf32>
    %cst_25 = arith.constant dense<0.000000e+00> : vector<1xf32>
    %38 = vector.multi_reduction <add>, %37, %cst_25 [1, 2] : vector<1x8x256xf32> to vector<1xf32>
    %39 = vector.shape_cast %38 : vector<1xf32> to vector<1x1x1xf32>
    %40 = vector.extract %39[0, 0, 0] : f32 from vector<1x1x1xf32>
    %41 = vector.broadcast %40 : f32 to vector<1x1xf32>
    %42 = vector.shape_cast %41 : vector<1x1xf32> to vector<1x1x1xf32>
    %43 = arith.addf %33, %42 : vector<1x1x1xf32>
    %c0_26 = arith.constant 0 : index
    %c0_27 = arith.constant 0 : index
    %c0_28 = arith.constant 0 : index
    %44 = vector.load %arg9[%c0_26, %c0_27, %c0_28] : memref<1x1x1xf32, #tpu.memory_space<vmem>>, vector<1x1x1xf32>
    tpu.vector_store %arg9[%c0_26, %c0_27, %c0_28], %43 {strides = array<i32>} : memref<1x1x1xf32, #tpu.memory_space<vmem>>, vector<1x1x1xf32>,
    return
  }
  func.func @transform_0(%arg0: i32, %arg1: i32, %arg2: i32) -> (i32, i32) {
    %c1_i32 = arith.constant 1 : i32
    %0 = arith.muli %arg0, %c1_i32 : i32
    %1 = arith.addi %0, %arg1 : i32
    %c0_i32 = arith.constant 0 : i32
    return %1, %arg2 : i32, i32
  }
  func.func @transform_1(%arg0: i32, %arg1: i32, %arg2: i32) -> (i32, i32) {
    %c1_i32 = arith.constant 1 : i32
    %0 = arith.muli %arg0, %c1_i32 : i32
    %1 = arith.addi %0, %arg1 : i32
    %c0_i32 = arith.constant 0 : i32
    return %1, %arg2 : i32, i32
  }
  func.func @transform_2(%arg0: i32, %arg1: i32, %arg2: i32) -> (i32, i32) {
    %c1_i32 = arith.constant 1 : i32
    %0 = arith.muli %arg0, %c1_i32 : i32
    %1 = arith.addi %0, %arg1 : i32
    %c0_i32 = arith.constant 0 : i32
    return %1, %arg2 : i32, i32
  }
  func.func @transform_3(%arg0: i32, %arg1: i32, %arg2: i32) -> (i32, i32) {
    %c0_i32 = arith.constant 0 : i32
    %c0_i32_0 = arith.constant 0 : i32
    return %c0_i32, %arg2 : i32, i32
  }
  func.func @transform_4(%arg0: i32, %arg1: i32, %arg2: i32) -> (i32, i32, i32) {
    %c0_i32 = arith.constant 0 : i32
    %c0_i32_0 = arith.constant 0 : i32
    %c0_i32_1 = arith.constant 0 : i32
    return %arg0, %c0_i32, %c0_i32_0 : i32, i32, i32
  }
  func.func @transform_5(%arg0: i32, %arg1: i32, %arg2: i32) -> (i32, i32, i32) {
    %c0_i32 = arith.constant 0 : i32
    %c0_i32_0 = arith.constant 0 : i32
    %c0_i32_1 = arith.constant 0 : i32
    return %arg0, %c0_i32, %c0_i32_0 : i32, i32, i32
  }
  func.func @transform_6(%arg0: i32, %arg1: i32, %arg2: i32) -> (i32, i32, i32) {
    %c0_i32 = arith.constant 0 : i32
    %c0_i32_0 = arith.constant 0 : i32
    %c0_i32_1 = arith.constant 0 : i32
    return %arg0, %c0_i32, %c0_i32_0 : i32, i32, i32
  }
}

</mosaic_0001>

<bundles_post_ra>
// kernel: tpu_custom_call.1
= control target key start
LH: loop header
LB: loop body
LE: loop exit
PB: predicated region body
PF: predicated region fallthrough
CT: control target
= control target key end

     0   :  { %12 = vsyncpa [#allocation3], 0  ;;  %s492_s0 = inlined_call_operand.hbm [shape: f32[8,256], index: 0, kind: input, shape index: {}]   ;;  %s493_s1 = inlined_call_operand.hbm [shape: f32[8,256], index: 1, kind: input, shape index: {}]   ;;  %s494_s2 = inlined_call_operand.hbm [shape: f32[8,256], index: 2, kind: input, shape index: {}]   ;;  %s495_s3 = inlined_call_operand.vmem [shape: f32[1,256], index: 3, kind: input, shape index: {}]   ;;  %s496_s4 = inlined_call_operand.hbm [shape: f32[1,1,1], index: 4, kind: output, shape index: {0}]   ;;  %s497_s5 = inlined_call_operand.hbm [shape: f32[1,1,1], index: 5, kind: output, shape index: {1}]   ;;  %s498_s6 = inlined_call_operand.hbm [shape: f32[1,1,1], index: 6, kind: output, shape index: {2}]  }
   0x1   :  { %13 = vsyncpa [#allocation6], 0 }
   0x2   :  { %14 = vsyncpa [#allocation4], 0 }
   0x3   :  { %15 = vsyncpa [#allocation10], 0  ;;  %s353_s21 = smov [#allocation5]   ;;  %s354_s23 = smov [#allocation2]  }
   0x4   :  { %s40_s22 = sshll.u32 %s353_s21, 4  ;;  %s26_s24 = sshll.u32 %s354_s23, 4  ;;  %s41_s22 = int_to_ptr.vmem [resolvable:$true] %s40_s22  ;;  %s27_s24 = int_to_ptr.vmem [resolvable:$true] %s26_s24 }
   0x5   :  { %s213_s27 = scalar_lea.hbm %s493_s1, 256 }
   0x6   :  { %p214_p0 = scmp.ne.s32.totalorder %s493_s1, %s213_s27  ;;  %p217_p1 = scmp.lt.u32.totalorder %s213_s27, %s493_s1 }
   0x8   :  { %p219_p2 = pnand %p217_p1, %p214_p0 }
   0xa   :  { %222 = shalt.err (!%p219_p2)
}
   0xb   :  { %s223_s8 = scalar_lea.vmem %s41_s22, 256  ;;  %p228_p4 = scmp.lt.s32.totalorder %s41_s22, %s41_s22 }
   0xc   :  { %p224_p3 = scmp.ne.s32.totalorder %s41_s22, %s223_s8  ;;  %p229_p5 = scmp.lt.s32.totalorder %s223_s8, %s223_s8 }
   0xe   :  { %p230_p6 = por %p229_p5, %p228_p4 }
  0x10   :  { %p231_p7 = pnand %p230_p6, %p224_p3 }
  0x12   :  { %234 = shalt.err (!%p231_p7)
}
  0x13   :  { %43 = dma.hbm_to_vmem [thread:$0]  %s493_s1, 256, %s41_s22, [#allocation6]  }
  0x14   :  { %s235_s13 = scalar_lea.hbm %s492_s0, 256 }
  0x15   :  { %p236_p8 = scmp.ne.s32.totalorder %s492_s0, %s235_s13  ;;  %p239_p9 = scmp.lt.u32.totalorder %s235_s13, %s492_s0 }
  0x17   :  { %p241_p10 = pnand %p239_p9, %p236_p8 }
  0x19   :  { %244 = shalt.err (!%p241_p10)
}
  0x1a   :  { %s245_s18 = scalar_lea.vmem %s27_s24, 256  ;;  %p250_p12 = scmp.lt.s32.totalorder %s27_s24, %s27_s24 }
  0x1b   :  { %p246_p11 = scmp.ne.s32.totalorder %s27_s24, %s245_s18  ;;  %p251_p13 = scmp.lt.s32.totalorder %s245_s18, %s245_s18 }
  0x1d   :  { %p252_p0 = por %p251_p13, %p250_p12 }
  0x1f   :  { %p253_p1 = pnand %p252_p0, %p246_p11 }
  0x21   :  { %256 = shalt.err (!%p253_p1)
}
  0x22   :  { %29 = dma.hbm_to_vmem [thread:$0]  %s492_s0, 256, %s27_s24, [#allocation3]  }
  0x23   :  { %s355_s20 = smov [#allocation7]   ;;  %s257_s25 = scalar_lea.hbm %s494_s2, 256 }
  0x24   :  { %s54_s21 = sshll.u32 %s355_s20, 4  ;;  %p258_p2 = scmp.ne.s32.totalorder %s494_s2, %s257_s25  ;;  %s55_s21 = int_to_ptr.vmem [resolvable:$true] %s54_s21 }
  0x25   :  { %p261_p3 = scmp.lt.u32.totalorder %s257_s25, %s494_s2 }
  0x27   :  { %p263_p4 = pnand %p261_p3, %p258_p2 }
  0x29   :  { %266 = shalt.err (!%p263_p4)
}
  0x2a   :  { %s267_s30 = scalar_lea.vmem %s55_s21, 256  ;;  %p272_p6 = scmp.lt.s32.totalorder %s55_s21, %s55_s21 }
  0x2b   :  { %p268_p5 = scmp.ne.s32.totalorder %s55_s21, %s267_s30  ;;  %p273_p7 = scmp.lt.s32.totalorder %s267_s30, %s267_s30 }
  0x2d   :  { %p274_p8 = por %p273_p7, %p272_p6 }
  0x2f   :  { %p275_p9 = pnand %p274_p8, %p268_p5 }
  0x31   :  { %278 = shalt.err (!%p275_p9)
}
  0x32   :  { %57 = dma.hbm_to_vmem [thread:$0]  %s494_s2, 256, %s55_s21, [#allocation6]  }
  0x33   :  { %345 = dma.done.wait [#allocation3], 256  }
  0x34   :  { %346 = vsyncadd [#allocation3], 4294967040 }
  0x35   :  { %347 = dma.done.wait [#allocation6], 512  }
  0x36   :  { %348 = vsyncadd [#allocation6], 4294966784  ;;  %v94_v0 = vlaneseq  ;;  %v82_v4 = vld [vmem:[#allocation7] sm:$0xff]  ;;  %v83_v5 = vld [vmem:[#allocation7 + $0x8] sm:$0xff]  ;;  %vm78_vm0 = vcmask 0   ;;  %v356_v30 = vmov 0.0  }
  0x37   :  { %v88_v6 = vld [vmem:[#allocation5] sm:$0xff]  ;;  %v89_v7 = vld [vmem:[#allocation5 + $0x8] sm:$0xff]  ;;  %v92_v9 = vld [vmem:[%s495_s3] sm:$0x3]  ;;  %79 = vst.msk [vmem:[#allocation8] sm:$0x1] %vm78_vm0, %v356_v30 }
  0x38   :  { %v95_v1 = vshrl.u32 %v94_v0, 7  ;;  %v90_v8 = vsub.f32 %v88_v6, %v82_v4  ;;  %v84_v10 = vld [vmem:[#allocation2] sm:$0xff]  ;;  %v91_v11 = vsub.f32 %v89_v7, %v83_v5  ;;  %v85_v14 = vld [vmem:[#allocation2 + $0x8] sm:$0xff]  ;;  %80 = vst.msk [vmem:[#allocation9] sm:$0x1] %vm78_vm0, %v356_v30  ;;  %s357_s3 = smov [#allocation8]  }
  0x39   :  { %v86_v15 = vsub.f32 %v84_v10, %v82_v4  ;;  %v87_v17 = vsub.f32 %v85_v14, %v83_v5  ;;  %81 = vst.msk [vmem:[#allocation11] sm:$0x1] %vm78_vm0, %v356_v30  ;;  %s163_s9 = sshll.u32 %s357_s3, 4  ;;  %s358_s10 = smov [#allocation9]   ;;  %s164_s9 = int_to_ptr.vmem [resolvable:$true] %s163_s9 }
  0x3a   :  { %v96_v2 = vsub.s32 0, %v95_v1  ;;  %v100_v3 = vsub.s32 1, %v95_v1  ;;  %v140_v16 = vmul.f32 %v90_v8, %v90_v8  ;;  %v141_v18 = vmul.f32 %v91_v11, %v91_v11  ;;  %s173_s11 = sshll.u32 %s358_s10, 4  ;;  %s359_s13 = smov [#allocation11]   ;;  %s438_s11 = int_to_ptr.vmem [resolvable:$true] %s173_s11 }
  0x3b   :  { %s183_s14 = sshll.u32 %s359_s13, 4  ;;  %s279_s16 = scalar_lea.vmem %s164_s9, 16  ;;  %s452_s14 = int_to_ptr.vmem [resolvable:$true] %s183_s14 }
  0x3c   :  { %v97_v12 = vrot.slane %v92_v9, %v96_v2  ;;  %v101_v13 = vrot.slane %v92_v9, %v100_v3  ;;  %p280_p10 = scmp.ne.s32.totalorder %s164_s9, %s279_s16  ;;  %s283_s17 = scalar_lea.vmem %s164_s9, 32 }
  0x3d   :  { %p284_p11 = scmp.lt.s32.totalorder %s164_s9, %s164_s9  ;;  %p285_p12 = scmp.lt.s32.totalorder %s283_s17, %s279_s16 }
  0x3e   :  { %v104_v19 = vmul.f32 %v97_v12, %v86_v15  ;;  %v142_v20 = vmul.f32 %v140_v16, %v97_v12  ;;  %v105_v21 = vmul.f32 %v101_v13, %v87_v17  ;;  %v143_v22 = vmul.f32 %v141_v18, %v101_v13  ;;  %v106_v52 = vld [vmem:[#allocation8] sm:$0x1] }
  0x3f   :  { %v123_v55 = vld [vmem:[#allocation9] sm:$0x1]  ;;  %p286_p13 = por %p285_p12, %p284_p11 }
  0x40   :  { %v107_v23 = vmul.f32 %v104_v19, %v90_v8  ;;  %v108_v24 = vmul.f32 %v105_v21, %v91_v11  ;;  %v124_v25 = vmul.f32 %v104_v19, %v86_v15  ;;  %v125_v26 = vmul.f32 %v105_v21, %v87_v17  ;;  %v139_v56 = vld [vmem:[#allocation11] sm:$0x1] }
  0x41   :  { %v144_v27 = vadd.f32 %v143_v22, %v142_v20  ;;  %p287_p0 = pnand %p286_p13, %p280_p10 }
  0x42   :  { %v109_v28 = vadd.f32 %v108_v24, %v107_v23  ;;  %v126_v29 = vadd.f32 %v125_v26, %v124_v25 }
  0x43   :  { %145 = vadd.xlane.f32.xlu1 %v144_v27 }
  0x44   :  { %110 = vadd.xlane.f32.xlu0 %v109_v28 }
  0x48   :  { %127 = vadd.xlane.f32.xlu0 %v126_v29 }
  0xd0   :  { %v146_v31 = vpop.xlane.xlu1 %145 }
  0xd1   :  { %v147_v32 = vrot.slane %v146_v31, 4  ;;  %v111_v33 = vpop.xlane.xlu0 %110 }
  0xd2   :  { %v112_v34 = vrot.slane %v111_v33, 4 }
  0xd3   :  { %v148_v35 = vadd.f32 %v147_v32, %v146_v31 }
  0xd4   :  { %v113_v36 = vadd.f32 %v112_v34, %v111_v33 }
  0xd5   :  { %v149_v37 = vrot.slane %v148_v35, 2  ;;  %v128_v38 = vpop.xlane.xlu0 %127 }
  0xd6   :  { %v114_v39 = vrot.slane %v113_v36, 2  ;;  %v129_v40 = vrot.slane %v128_v38, 4 }
  0xd7   :  { %v150_v43 = vadd.f32 %v149_v37, %v148_v35 }
  0xd8   :  { %v130_v41 = vadd.f32 %v129_v40, %v128_v38  ;;  %v115_v42 = vadd.f32 %v114_v39, %v113_v36 }
  0xd9   :  { %v151_v48 = vrot.slane %v150_v43, 1 }
  0xda   :  { %v131_v44 = vrot.slane %v130_v41, 2  ;;  %v116_v45 = vrot.slane %v115_v42, 1 }
  0xdb   :  { %v152_v51 = vadd.f32 %v151_v48, %v150_v43 }
  0xdc   :  { %v132_v46 = vadd.f32 %v131_v44, %v130_v41  ;;  %v117_v47 = vadd.f32 %v116_v45, %v115_v42 }
  0xde   :  { %200 = vpush %v117_v47  ;;  %v133_v49 = vrot.slane %v132_v46, 1 }
  0xe0   :  { %v134_v50 = vadd.f32 %v133_v49, %v132_v46 }
  0xe2   :  { %202 = vpush %v134_v50 }
  0xe3   :  { %204 = vpush %v152_v51 }
 0x10f   :  { %s201_s2 = spop %200 }
 0x110   :  { %v119_v53 = vstv %s201_s2 }
 0x111   :  { %v120_v54 = vadd.f32 %v119_v53, %v106_v52 }
 0x113   :  { %122 = vst.msk [vmem:[#allocation8] sm:$0x1] %vm78_vm0, %v120_v54  ;;  %s203_s12 = spop %202 }
 0x114   :  { %v136_v57 = vstv %s203_s12  ;;  %s205_s15 = spop %204 }
 0x115   :  { %v137_v58 = vadd.f32 %v136_v57, %v123_v55  ;;  %v154_v59 = vstv %s205_s15 }
 0x116   :  { %290 = shalt.err (!%p287_p0)
}
 0x117   :  { %s291_s19 = scalar_lea.hbm %s496_s4, 16 }
 0x118   :  { %p292_p1 = scmp.ne.s32.totalorder %s496_s4, %s291_s19  ;;  %p295_p2 = scmp.lt.u32.totalorder %s291_s19, %s496_s4 }
 0x11a   :  { %p297_p3 = pnand %p295_p2, %p292_p1 }
 0x11c   :  { %300 = shalt.err (!%p297_p3)
}
 0x11d   :  { %166 = dma.vmem_to_hbm [thread:$0]  %s164_s9, 16, %s496_s4, [#allocation4]   ;;  %v155_v60 = vadd.f32 %v154_v59, %v139_v56  ;;  %138 = vst.msk [vmem:[#allocation9] sm:$0x1] %vm78_vm0, %v137_v58 }
 0x11e   :  { %s301_s27 = scalar_lea.vmem %s438_s11, 16  ;;  %s305_s28 = scalar_lea.vmem %s438_s11, 32 }
 0x11f   :  { %156 = vst.msk [vmem:[#allocation11] sm:$0x1] %vm78_vm0, %v155_v60  ;;  %p302_p4 = scmp.ne.s32.totalorder %s438_s11, %s301_s27  ;;  %p306_p5 = scmp.lt.s32.totalorder %s438_s11, %s438_s11 }
 0x120   :  { %p307_p6 = scmp.lt.s32.totalorder %s305_s28, %s301_s27 }
 0x122   :  { %p308_p7 = por %p307_p6, %p306_p5 }
 0x124   :  { %p309_p8 = pnand %p308_p7, %p302_p4 }
 0x126   :  { %312 = shalt.err (!%p309_p8)
}
 0x127   :  { %s313_s4 = scalar_lea.hbm %s497_s5, 16 }
 0x128   :  { %p314_p9 = scmp.ne.s32.totalorder %s497_s5, %s313_s4  ;;  %p317_p10 = scmp.lt.u32.totalorder %s313_s4, %s497_s5 }
 0x12a   :  { %p319_p11 = pnand %p317_p10, %p314_p9 }
 0x12c   :  { %322 = shalt.err (!%p319_p11)
}
 0x12d   :  { %176 = dma.vmem_to_hbm [thread:$0]  %s438_s11, 16, %s497_s5, [#allocation10]  }
 0x12e   :  { %s323_s9 = scalar_lea.vmem %s452_s14, 16  ;;  %s327_s10 = scalar_lea.vmem %s452_s14, 32 }
 0x12f   :  { %p324_p12 = scmp.ne.s32.totalorder %s452_s14, %s323_s9  ;;  %p328_p13 = scmp.lt.s32.totalorder %s452_s14, %s452_s14 }
 0x130   :  { %p329_p0 = scmp.lt.s32.totalorder %s327_s10, %s323_s9 }
 0x132   :  { %p330_p1 = por %p329_p0, %p328_p13 }
 0x134   :  { %p331_p2 = pnand %p330_p1, %p324_p12 }
 0x136   :  { %334 = shalt.err (!%p331_p2)
}
 0x137   :  { %s335_s15 = scalar_lea.hbm %s498_s6, 16 }
 0x138   :  { %p336_p3 = scmp.ne.s32.totalorder %s498_s6, %s335_s15  ;;  %p339_p4 = scmp.lt.u32.totalorder %s335_s15, %s498_s6 }
 0x13a   :  { %p341_p5 = pnand %p339_p4, %p336_p3 }
 0x13c   :  { %344 = shalt.err (!%p341_p5)
}
 0x13d   :  { %186 = dma.vmem_to_hbm [thread:$0]  %s452_s14, 16, %s498_s6, [#allocation10]  }
 0x13e   :  { %349 = dma.done.wait [#allocation4], 16  }
 0x13f   :  { %350 = vsyncadd [#allocation4], 4294967280 }
 0x140   :  { %351 = dma.done.wait [#allocation10], 32  }
 0x141   :  { %352 = vsyncadd [#allocation10], 4294967264 }
 0x142   :  { %196 = vsyncpa [#allocation3], 1 }
 0x143   :  { %197 = vsyncpa [#allocation6], 1 }
 0x144   :  { %198 = vsyncpa [#allocation4], 1 }
 0x145   :  { %199 = vsyncpa [#allocation10], 1 }

</bundles_post_ra>
